<compile_context>
chip_gen: v5e
topology: v5e:2x2
jax: 0.10.0
libtpu: 0.0.40
codegen_flags: <defaults>
</compile_context>

<pallas_src>
import jax
import jax.numpy as jnp
from jax.experimental import pallas as pl
from jax.experimental.pallas import tpu as pltpu


def _round_up(x, m):
    return ((x + m - 1) // m) * m


_MIB = 1024 * 1024


def _vmem_budget_and_pair_tiles():
    """Generation-aware scoped-VMEM limit and pair-output tile caps.

    v7x has 64 MiB VMEM per TC -> keep the scoped limit at 48 MiB and pair
    tiles at (128, 256) (16 MiB f32 output block, 32 MiB double-buffered).
    v5e/v6e have 128 MiB -> raise the limit to 100 MiB and grow the pair tile
    to (256, 256) (32 MiB block, 64 MiB double-buffered) to shave the
    remaining per-step overhead on the write-bound pair kernel.
    """
    try:
        cap = pltpu.get_tpu_info().vmem_capacity_bytes
    except Exception:
        cap = 64 * _MIB              # conservative (v7x-sized) fallback
    if cap >= 120 * _MIB:            # v5e / v6e
        return 100 * _MIB, 256, 256
    return 48 * _MIB, 128, 256       # v7x or unknown


# ----------------------------- Pallas kernels ------------------------------


def _tf_proj_fused_kernel(tf_ref, w_ref, b_ref, out_ref):
    """out = tf @ [W_i | W_j | W_m] + [b_i | b_j | b_m] in one MXU pass."""
    out_ref[...] = (jnp.dot(tf_ref[...], w_ref[...],
                            preferred_element_type=jnp.float32)
                    + b_ref[...]).astype(out_ref.dtype)


def _msa_emb_kernel(msa_ref, tfm_ref, w_ref, b_ref, out_ref):
    """out = msa @ W_msa + b_msa + tf_m  (tf_m precomputed, broadcast over C)."""
    msa = msa_ref[...]                                    # (bc, bn, Kpad)
    bc, bn, km = msa.shape
    proj = jnp.dot(msa.reshape(bc * bn, km), w_ref[...],
                   preferred_element_type=jnp.float32)    # (bc*bn, d_msa)
    proj = proj.reshape(bc, bn, -1) + b_ref[...]          # bias (1, d) broadcasts
    out_ref[...] = (proj + tfm_ref[...][None, :, :]).astype(out_ref.dtype)
    # TODO(synk): for v7x-native MXU throughput, optionally cast the dot
    # operands to bf16 here (f32 accumulate stays via preferred_element_type).


def _pair_add_kernel(tfi_ref, tfj_ref, out_ref):
    """Pure broadcast add: out[i, j, :] = tf_i[i, :] + tf_j[j, :].

    The add is written straight into the output block (no extra full-block
    VMEM temporary should be materialized by Mosaic for this broadcast).
    """
    out_ref[...] = (tfi_ref[...][:, None, :]
                    + tfj_ref[...][None, :, :]).astype(out_ref.dtype)


# ------------------------------ Python wrapper ------------------------------


class InputEmbedderPallas:
    """JAX/Pallas re-implementation of unifold InputEmbedder.forward."""

    def __init__(self, tf_dim, msa_dim, d_pair, d_msa, relpos_k,
                 use_chain_relative=False, max_relative_chain=None, *,
                 key=jax.random.PRNGKey(0), dtype=jnp.float32, out_dtype=None,
                 pair_tile_i=None, pair_tile_j=None,
                 msa_tile_c=64, msa_tile_n=256,
                 vmem_limit_bytes=None):
        self.tf_dim = tf_dim
        self.msa_dim = msa_dim
        self.d_pair = d_pair
        self.d_msa = d_msa
        self.relpos_k = relpos_k
        self.use_chain_relative = use_chain_relative
        self.max_relative_chain = max_relative_chain
        self.dtype = dtype
        # Downstream-facing dtype for msa_emb / pair_emb.  Both kernels are
        # HBM-write-bound, so out_dtype=jnp.bfloat16 roughly halves their cost
        # when the trunk accepts bf16; default f32 preserves exact reference
        # comparison.
        self.out_dtype = dtype if out_dtype is None else out_dtype

        auto_vmem, auto_ti, auto_tj = _vmem_budget_and_pair_tiles()
        self.vmem_limit_bytes = (auto_vmem if vmem_limit_bytes is None
                                 else vmem_limit_bytes)
        self.pair_tile_i = auto_ti if pair_tile_i is None else pair_tile_i
        self.pair_tile_j = auto_tj if pair_tile_j is None else pair_tile_j
        self.msa_tile_c = msa_tile_c
        self.msa_tile_n = msa_tile_n

        # Pad contraction dims to a multiple of 8 (sublane-clean MXU tiles);
        # lane (output) dims d_pair/d_msa stay as-is (128/256 at real sizes).
        self.tf_dim_pad = _round_up(tf_dim, 8)
        self.msa_dim_pad = _round_up(msa_dim, 8)

        def init_linear(k, d_in, d_out):
            kw, kb = jax.random.split(k)
            w = jax.random.normal(kw, (d_in, d_out), dtype) * 0.02
            b = jax.random.normal(kb, (1, d_out), dtype) * 0.01
            return w, b

        def pad_rows(w, d_in_pad):
            return jnp.pad(w, ((0, d_in_pad - w.shape[0]), (0, 0)))

        k1, k2, k3, k4, _k5 = jax.random.split(key, 5)
        # Canonical (unpadded) params — used by the pure-JAX reference.
        self.w_tf_z_i, self.b_tf_z_i = init_linear(k1, tf_dim, d_pair)
        self.w_tf_z_j, self.b_tf_z_j = init_linear(k2, tf_dim, d_pair)
        self.w_tf_m, self.b_tf_m = init_linear(k3, tf_dim, d_msa)
        self.w_msa_m, self.b_msa_m = init_linear(k4, msa_dim, d_msa)
        # Zero-row-padded copies used by the kernels (padded K contributes 0).
        w_tf_z_i_p = pad_rows(self.w_tf_z_i, self.tf_dim_pad)
        w_tf_z_j_p = pad_rows(self.w_tf_z_j, self.tf_dim_pad)
        w_tf_m_p = pad_rows(self.w_tf_m, self.tf_dim_pad)
        self.w_msa_m_p = pad_rows(self.w_msa_m, self.msa_dim_pad)
        # Fused tf-projection weight/bias: [W_i | W_j | W_m] -> one wide matmul.
        self.w_tf_cat_p = jnp.concatenate([w_tf_z_i_p, w_tf_z_j_p, w_tf_m_p],
                                          axis=1)            # (Kt, 2*dp + dm)
        self.b_tf_cat = jnp.concatenate([self.b_tf_z_i, self.b_tf_z_j,
                                         self.b_tf_m], axis=1)  # (1, 2*dp + dm)
        # TODO(synk): relpos_emb / linear_relpos are not exercised by forward();
        # only the forward() hot path is kernelized.

    def __call__(self, tf, msa):
        # PyTorch: if tf_dim == 21: tf = tf[..., 1:]   (glue, stays in JAX)
        if self.tf_dim == 21:
            tf = tf[..., 1:]
        tf = tf.astype(self.dtype)
        msa = msa.astype(self.dtype)

        B, N, tfd = tf.shape
        _, C, _, msad = msa.shape
        assert tfd == self.tf_dim and msad == self.msa_dim

        # One-time host-side zero padding of contraction dims.
        Kt = self.tf_dim_pad
        Km = self.msa_dim_pad
        tf_p = tf if Kt == tfd else jnp.pad(tf, ((0, 0), (0, 0), (0, Kt - tfd)))
        msa_p = (msa if Km == msad
                 else jnp.pad(msa, ((0, 0), (0, 0), (0, 0), (0, Km - msad))))

        cparams = lambda nsem: pltpu.CompilerParams(
            dimension_semantics=("parallel",) * nsem,
            vmem_limit_bytes=self.vmem_limit_bytes)

        dp, dm = self.d_pair, self.d_msa
        d_all = 2 * dp + dm

        # ---- 1) fused tf projections, one grid step per batch element ----
        tf_proj = pl.pallas_call(
            _tf_proj_fused_kernel,
            out_shape=jax.ShapeDtypeStruct((B, N, d_all), self.dtype),
            grid=(B,),
            in_specs=[
                pl.BlockSpec((None, N, Kt), lambda b: (b, 0, 0)),
                pl.BlockSpec((Kt, d_all), lambda b: (0, 0)),
                pl.BlockSpec((1, d_all), lambda b: (0, 0)),
            ],
            out_specs=pl.BlockSpec((None, N, d_all), lambda b: (b, 0, 0)),
            compiler_params=cparams(1),
        )(tf_p, self.w_tf_cat_p, self.b_tf_cat)

        # Tiny host-side slices of the fused projection (cheap XLA slices).
        tf_i = tf_proj[..., :dp]
        tf_j = tf_proj[..., dp:2 * dp]
        tf_m = tf_proj[..., 2 * dp:]

        # ---- 2) msa_emb = msa @ W_msa + b_msa + tf_m (tf_m NOT recomputed) ----
        bc = min(C, self.msa_tile_c)
        bn = min(N, self.msa_tile_n)
        # Grid order (B, n, c): tf_m's block index is constant across the
        # innermost c axis -> Pallas does not re-DMA it per cluster tile.
        # Remainder tiles (N % bn or C % bc != 0) use Pallas masked edge blocks.
        msa_emb = pl.pallas_call(
            _msa_emb_kernel,
            out_shape=jax.ShapeDtypeStruct((B, C, N, dm), self.out_dtype),
            grid=(B, pl.cdiv(N, bn), pl.cdiv(C, bc)),
            in_specs=[
                pl.BlockSpec((None, bc, bn, Km), lambda b, n, c: (b, c, n, 0)),
                pl.BlockSpec((None, bn, dm), lambda b, n, c: (b, n, 0)),
                pl.BlockSpec((Km, dm), lambda b, n, c: (0, 0)),
                pl.BlockSpec((1, dm), lambda b, n, c: (0, 0)),
            ],
            out_specs=pl.BlockSpec((None, bc, bn, dm),
                                   lambda b, n, c: (b, c, n, 0)),
            compiler_params=cparams(3),
        )(msa_p, tf_m, self.w_msa_m_p, self.b_msa_m)

        # ---- 3) pair_emb = tf_i[:, None, :] + tf_j[None, :, :] (broadcast add) ----
        bi = min(N, self.pair_tile_i)
        bj = min(N, self.pair_tile_j)
        # TODO(synk): at toy d_pair<128 the stores are sub-lane-width; real
        # model sizes (d_pair=128) are already lane-dense.
        pair_emb = pl.pallas_call(
            _pair_add_kernel,
            out_shape=jax.ShapeDtypeStruct((B, N, N, dp), self.out_dtype),
            grid=(B, pl.cdiv(N, bi), pl.cdiv(N, bj)),
            in_specs=[
                pl.BlockSpec((None, bi, dp), lambda b, i, j: (b, i, 0)),
                pl.BlockSpec((None, bj, dp), lambda b, i, j: (b, j, 0)),
            ],
            out_specs=pl.BlockSpec((None, bi, bj, dp),
                                   lambda b, i, j: (b, i, j, 0)),
            compiler_params=cparams(3),
        )(tf_i, tf_j)

        return msa_emb, pair_emb

    # Pure-JAX reference for validation (uses unpadded weights).
    def reference(self, tf, msa):
        if self.tf_dim == 21:
            tf = tf[..., 1:]
        tf = tf.astype(self.dtype)
        msa = msa.astype(self.dtype)
        msa_emb = msa @ self.w_msa_m + self.b_msa_m[0]
        tf_m = tf @ self.w_tf_m + self.b_tf_m[0]
        msa_emb = msa_emb + tf_m[:, None, :, :]
        tf_i = tf @ self.w_tf_z_i + self.b_tf_z_i[0]
        tf_j = tf @ self.w_tf_z_j + self.b_tf_z_j[0]
        pair_emb = tf_i[:, :, None, :] + tf_j[:, None, :, :]
        return msa_emb.astype(self.out_dtype), pair_emb.astype(self.out_dtype)


if __name__ == "__main__":
    # Small shapes consistent with the module's forward:
    #   tf_dim=21 (so raw tf has 22 feats and the first is dropped),
    #   msa_dim=24, d_pair=32, d_msa=32, batch=2, n_res=8, n_clust=4.
    B, N, C = 2, 8, 4
    tf_dim, msa_dim, d_pair, d_msa = 21, 24, 32, 32

    key = jax.random.PRNGKey(0)
    k_tf, k_msa, k_params = jax.random.split(key, 3)
    tf = jax.random.normal(k_tf, (B, N, tf_dim + 1), jnp.float32)
    msa = jax.random.normal(k_msa, (B, C, N, msa_dim), jnp.float32)

    embedder = InputEmbedderPallas(tf_dim=tf_dim, msa_dim=msa_dim,
                                   d_pair=d_pair, d_msa=d_msa,
                                   relpos_k=32, key=k_params)

    msa_emb, pair_emb = embedder(tf, msa)
    jax.block_until_ready((msa_emb, pair_emb))

    ref_msa, ref_pair = embedder.reference(tf, msa)
    assert msa_emb.shape == (B, C, N, d_msa)
    assert pair_emb.shape == (B, N, N, d_pair)
    assert jnp.allclose(msa_emb, ref_msa, atol=1e-5, rtol=1e-5)
    assert jnp.allclose(pair_emb, ref_pair, atol=1e-5, rtol=1e-5)

    print("KERNEL_OK")
</pallas_src>

<mosaic_0001>
module attributes {stable_mosaic.version = 11 : i64} {
  func.func @_tf_proj_fused_kernel(%arg0: i32, %arg1: memref<1x8x24xf32, #tpu.memory_space<vmem>>, %arg2: memref<24x96xf32, #tpu.memory_space<vmem>>, %arg3: memref<1x96xf32, #tpu.memory_space<vmem>>, %arg4: memref<1x8x96xf32, #tpu.memory_space<vmem>>) attributes {dimension_semantics = [#tpu.dimension_semantics<parallel>], iteration_bounds = array<i64: 2>, scalar_prefetch = 0 : i64, scratch_operands = 0 : i64, tpu.core_type = #tpu.core_type<tc>, window_params = [{transform_indices = @transform_0, window_bounds = array<i64: 1, 8, 24>}, {pipeline_mode = #tpu.pipeline_mode<synchronous>, transform_indices = @transform_1, window_bounds = array<i64: 24, 96>}, {pipeline_mode = #tpu.pipeline_mode<synchronous>, transform_indices = @transform_2, window_bounds = array<i64: 1, 96>}, {transform_indices = @transform_3, window_bounds = array<i64: 1, 8, 96>}]} {
    %c0 = arith.constant 0 : index
    %c0_0 = arith.constant 0 : index
    %c0_1 = arith.constant 0 : index
    %0 = vector.load %arg1[%c0, %c0_0, %c0_1] : memref<1x8x24xf32, #tpu.memory_space<vmem>>, vector<1x8x24xf32>
    %1 = vector.shape_cast %0 : vector<1x8x24xf32> to vector<8x24xf32>
    %c0_2 = arith.constant 0 : index
    %c0_3 = arith.constant 0 : index
    %2 = vector.load %arg2[%c0_2, %c0_3] : memref<24x96xf32, #tpu.memory_space<vmem>>, vector<24x96xf32>
    %cst = arith.constant dense<0.000000e+00> : vector<8x96xf32>
    %3 = tpu.matmul %1, %2, %cst {dimension_numbers = #tpu.dot_dimension_numbers<[1], [0], [0], [1], [0, 0, 1, 1], [], []>} : vector<8x24xf32>, vector<24x96xf32>, vector<8x96xf32> -> vector<8x96xf32>
    %c0_4 = arith.constant 0 : index
    %c0_5 = arith.constant 0 : index
    %4 = vector.load %arg3[%c0_4, %c0_5] : memref<1x96xf32, #tpu.memory_space<vmem>>, vector<1x96xf32>
    %5 = vector.broadcast %4 : vector<1x96xf32> to vector<8x96xf32>
    %6 = arith.addf %3, %5 : vector<8x96xf32>
    %c0_6 = arith.constant 0 : index
    %c0_7 = arith.constant 0 : index
    %c0_8 = arith.constant 0 : index
    %7 = vector.load %arg4[%c0_6, %c0_7, %c0_8] : memref<1x8x96xf32, #tpu.memory_space<vmem>>, vector<1x8x96xf32>
    %8 = vector.shape_cast %7 : vector<1x8x96xf32> to vector<8x96xf32>
    %9 = vector.shape_cast %6 : vector<8x96xf32> to vector<1x8x96xf32>
    tpu.vector_store %arg4[%c0_6, %c0_7, %c0_8], %9 {strides = array<i32>} : memref<1x8x96xf32, #tpu.memory_space<vmem>>, vector<1x8x96xf32>,
    return
  }
  func.func @transform_0(%arg0: i32) -> (i32, i32, i32) {
    %c0_i32 = arith.constant 0 : i32
    %c0_i32_0 = arith.constant 0 : i32
    %c0_i32_1 = arith.constant 0 : i32
    return %arg0, %c0_i32, %c0_i32_0 : i32, i32, i32
  }
  func.func @transform_1(%arg0: i32) -> (i32, i32) {
    %c0_i32 = arith.constant 0 : i32
    %c0_i32_0 = arith.constant 0 : i32
    %c0_i32_1 = arith.constant 0 : i32
    return %c0_i32, %c0_i32_0 : i32, i32
  }
  func.func @transform_2(%arg0: i32) -> (i32, i32) {
    %c0_i32 = arith.constant 0 : i32
    %c0_i32_0 = arith.constant 0 : i32
    %c0_i32_1 = arith.constant 0 : i32
    return %c0_i32, %c0_i32_0 : i32, i32
  }
  func.func @transform_3(%arg0: i32) -> (i32, i32, i32) {
    %c0_i32 = arith.constant 0 : i32
    %c0_i32_0 = arith.constant 0 : i32
    %c0_i32_1 = arith.constant 0 : i32
    return %arg0, %c0_i32, %c0_i32_0 : i32, i32, i32
  }
}

</mosaic_0001>

<bundles_post_ra>
// kernel: tpu_custom_call.1
= control target key start
LH: loop header
LB: loop body
LE: loop exit
PB: predicated region body
PF: predicated region fallthrough
CT: control target
= control target key end

     0   :  { %8 = vsyncpa [#allocation3], 0  ;;  %s704_s0 = inlined_call_operand.hbm [shape: f32[2,8,24], index: 0, kind: input, shape index: {}]   ;;  %s705_s1 = inlined_call_operand.hbm [shape: f32[24,96], index: 1, kind: input, shape index: {}]   ;;  %s706_s2 = inlined_call_operand.vmem [shape: f32[1,96], index: 2, kind: input, shape index: {}]   ;;  %s707_s3 = inlined_call_operand.hbm [shape: f32[2,8,96], index: 3, kind: output, shape index: {}]  }
   0x1   :  { %10 = vsyncpa [#allocation3 + $0x1], 0 }
   0x2   :  { %11 = vsyncpa [#allocation6], 0 }
   0x3   :  { %12 = vsyncpa [#allocation4], 0 }
   0x4   :  { %14 = vsyncpa [#allocation4 + $0x1], 0  ;;  %s565_s12 = smov 0   ;;  %s567_s13 = smov 0  }
   0x5   :  { %s569_s14 = smov 0   ;;  %s571_s15 = smov 0  }
   0x6 LB: > { %s130_s18 = sshll.u32 %s705_s1, 4  ;;  %s589_s19 = sadd.s32 4294967295, %s540_s15   ;;  %s540_s15 = sphi %s571_s15, %s717_s15   ;;  %s536_s14 = sphi %s569_s14, %s716_s14   ;;  %s532_s13 = sphi %s567_s13, %s715_s13   ;;  %s528_s12 = sphi %s565_s12, %s714_s12   ;;  %s131_s18 = int_to_ptr.hbm [resolvable:$true] %s130_s18 }
   0x7   : > { %p336_p0 = scmp.ge.s32.totalorder %s540_s15, 1  ;;  %p41_p1 = scmp.eq.s32.totalorder %s589_s19, 0 }
   0x8   : > { %p119_p2 = scmp.lt.s32.totalorder %s540_s15, 3  ;;  %s542_s21 = smov [#allocation5]  }
   0x9   : > { %s132_s22 = sshll.u32 %s542_s21, 4  ;;  %s543_s23 = smov 128   ;;  %s133_s22 = int_to_ptr.vmem [resolvable:$true] %s132_s22 }
   0xa   : > { %p594_p3 = pnand %p336_p0, %p119_p2  ;;  %s544_s24 = smov 8  }
   0xb   : > { %s335_s25 = sadd.s32 4294967294, %s540_s15   ;;  %s605_s26 = sadd.s32 1, %s540_s15  }
   0xc   : > { %p358_p4 = pneg %p594_p3  ;;  %s27_s27 = sadd.s32 1, %s536_s14 }
   0xd   : > { %s24_s28 = ssub.s32 %s540_s15, %s605_s26  ;;  %p34_p7 = scmp.ne.s32.totalorder %s536_s14, %s532_s13 }
   0xe   : > { %p359_p6 = pnand %p358_p4, %p41_p1  ;;  %p25_p8 = scmp.eq.s32.totalorder %s24_s28, 0 }
   0xf   : > { %p35_p9 = scmp.eq.s32.totalorder %s540_s15, 0  ;;  %p40_p10 = scmp.ne.s32.totalorder %s532_s13, %s528_s12 }
  0x10   : > { %361 = dma.hbm_to_vmem [thread:$0]  (!%p359_p6), %s131_s18, 384, %s133_s22, [#allocation6], %s543_s23, %s543_s23, %s544_s24  }
  0x11   : > { %p106_p11 = scmp.eq.s32.totalorder %s589_s19, 1  ;;  %p621_p12 = por %p41_p1, %p40_p10 }
  0x12   : > { %s617_s29 = scalar_select %p25_p8, %s536_s14, %s27_s27  }
  0x13   : > { %p625_p13 = por %p106_p11, %p34_p7  ;;  %p112_p0 = scmp.eq.s32.totalorder %s335_s25, 1 }
  0x14   : > { %p36_p2 = por %p35_p9, %p34_p7  ;;  %s149_s5 = sand.u32 1, %s536_s14  }
  0x15   : > { %p630_p4 = por %p112_p0, %p40_p10  ;;  %p371_p6 = scmp.lt.s32.totalorder %s540_s15, 2 }
  0x16   : > { %s339_s7 = sshll.u32 %s149_s5, 3  ;;  %s340_s8 = sshll.u32 %s540_s15, 3 }
  0x17   : > { %s157_s11 = scalar_lea.hbm %s704_s0, %s340_s8  ;;  %s153_s17 = scalar_lea.vmem [#allocation2], %s339_s7 }
  0x18   : > { %s159_s16 = sshll.u32 %s157_s11, 4  ;;  %s161_s18 = sshll.u32 %s153_s17, 4  ;;  %s160_s16 = int_to_ptr.hbm [resolvable:$true] %s159_s16  ;;  %s162_s18 = int_to_ptr.vmem [resolvable:$true] %s161_s18 }
  0x19   : > { %p639_p8 = pnand %p371_p6, %p36_p2  ;;  %s150_s22 = scalar_lea.sflag [#allocation3], %s149_s5 }
  0x1a   : > { %s440_s23 = sshra.s32 %s160_s16, 4  ;;  %s447_s28 = scalar_lea.hbm %s704_s0, 16  ;;  %s441_s23 = int_to_ptr.hbm [resolvable:$true] %s440_s23 }
  0x1b   : > { %s442_s24 = scalar_lea.hbm %s441_s23, 8  ;;  %p444_p9 = pneg %p639_p8 }
  0x1c   : > { %p443_p7 = scmp.ne.s32.totalorder %s441_s23, %s442_s24  ;;  %p448_p0 = scmp.lt.s32.totalorder %s441_s23, %s704_s0 }
  0x1d   : > { %p449_p2 = scmp.lt.s32.totalorder %s447_s28, %s442_s24 }
  0x1e   : > { %p445_p10 = pnand %p444_p9, %p443_p7 }
  0x1f   : > { %p450_p6 = por %p449_p2, %p448_p0 }
  0x20   : > { %p446_p11 = pneg %p445_p10 }
  0x22   : > { %p451_p5 = pnand %p450_p6, %p446_p11 }
  0x24   : > { %454 = shalt.err (!%p451_p5)
}
  0x25   : > { %365 = dma.hbm_to_vmem [thread:$0]  (!%p639_p8), %s160_s16, 128, %s162_s18, %s150_s22  }
  0x26   : > { %170 = sbr.rel (%p594_p3) target bundleno = 183 (0xb7), region = 32  ;;  %s656_s5 = sand.u32 (!%p594_p3), 1, %s532_s13  }
  0x27   : > { %s342_s9 = sshll.u32 (!%p594_p3), %s656_s5, 3  ;;  %s173_s10 = scalar_lea.sflag (!%p594_p3), [#allocation3], %s656_s5 }
  0x28   : > { %s176_s11 = scalar_lea.vmem (!%p594_p3), [#allocation2], %s342_s9 }
  0x2b   : > { %515 = dma.done.wait (%p621_p12), %s173_s10, 128  }
  0x2c   : > { %517 = vsyncadd (%p621_p12), %s173_s10, 4294967168 }
  0x2d   : > { %519 = dma.done.wait (%p41_p1), [#allocation6], 384  }
  0x2e   : > { %521 = vsyncadd (%p41_p1), [#allocation6], 4294966912  ;;  %v208_v0 = vld [vmem:[#allocation5 + $0x10] sm:$0xff]  ;;  %v207_v1 = vld [vmem:[#allocation5 + $0x8] sm:$0xff]  ;;  %vm213_vm0 = vcmask 195584   ;;  %s347_s20 = sshll.u32 %s589_s19, 3 }
  0x2f   : > { %230 = vmatpush.msra.mxu0 %v208_v0  ;;  %v206_v2 = vld [vmem:[#allocation5] sm:$0xff]  ;;  %v205_v3 = vld [vmem:[%s176_s11] sm:$0xff]  ;;  %s250_s17 = scalar_lea.hbm %s707_s3, %s347_s20  ;;  %s204_s22 = scalar_lea.vmem [#allocation7], %s342_s9  ;;  %vm237_vm1 = vcmask 785408  }
  0x30   : > { %v409_v4 = vld [vmem:[%s706_s2] ss:$0 sm:$0xff]  ;;  %s252_s23 = sshll.u32 %s204_s22, 4  ;;  %s254_s24 = sshll.u32 %s250_s17, 4  ;;  %s253_s23 = int_to_ptr.vmem [resolvable:$true] %s252_s23  ;;  %s255_s24 = int_to_ptr.hbm [resolvable:$true] %s254_s24 }
  0x31   : > { %231 = vmatpush.msra.mxu0 %v207_v1  ;;  %s240_s25 = scalar_lea.sflag [#allocation4], %s656_s5  ;;  %s484_s19 = sshra.s32 %s255_s24, 4  ;;  %s485_s19 = int_to_ptr.hbm [resolvable:$true] %s484_s19 }
  0x32   : > { %s486_s27 = scalar_lea.hbm %s485_s19, 8  ;;  %s490_s8 = scalar_lea.hbm %s707_s3, 16 }
  0x33   : > { %232 = vmatpush.msra.mxu0 %v206_v2  ;;  %p487_p1 = scmp.ne.s32.totalorder %s485_s19, %s486_s27  ;;  %p491_p12 = scmp.lt.s32.totalorder %s485_s19, %s707_s3 }
  0x34   : > { %345 = vmatmul.msk.f32.vlgmr.msra.gmra.mxu0 %vm213_vm0, %v205_v3  ;;  %p492_p8 = scmp.lt.s32.totalorder %s490_s8, %s486_s27 }
  0x35   : > { %p488_p3 = pnand %p487_p1, %p625_p13 }
  0x36   : > { %p493_p7 = por %p492_p8, %p491_p12 }
  0x37   : > { %p489_p5 = pneg %p488_p3 }
  0x39   : > { %p494_p9 = pnand %p493_p7, %p489_p5 }
  0xb1   : > { %v234_v5 = vpop.f32.mrf.mxu0 }
  0xb2   : > { %v235_v6 = vadd.f32 %v409_v4, %v234_v5 }
  0xb4   : > { %238 = vst.msk [vmem:[%s204_s22] sm:$0xff] %vm237_vm1, %v235_v6 }
  0xb5   : > { %497 = shalt.err (!%p494_p9)
}
  0xb6   : > { %356 = dma.vmem_to_hbm [thread:$0]  (%p625_p13), %s253_s23, 128, %s255_s24, %s240_s25  }
  0xb7 PF: > { %s266_s5 = sand.u32 1, %s528_s12   ;;  %p713_p10 = scmp.ge.s32.totalorder %s540_s15, 2 }
  0xb8   : > { %s267_s11 = scalar_lea.sflag [#allocation4], %s266_s5 }
  0xb9   : > { %p367_p11 = pnand %p713_p10, %p630_p4 }
  0xbb   : > { %p368_p0 = pneg %p367_p11 }
  0xbd   : > { %523 = dma.done.wait (%p368_p0), %s267_s11, 128  }
  0xbe   : > { %525 = vsyncadd (%p368_p0), %s267_s11, 4294967168  ;;  %p17_p2 = scmp.ge.s32.totalorder %s605_s26, 4   ;;  %s714_s12 = smov %s532_s13 }
  0xbf   : > { %s715_s13 = smov %s536_s14  ;;  %s716_s14 = smov %s617_s29 }
  0xc0   : > { %s717_s15 = smov %s605_s26  ;;  %19 = sbr.rel (!%p17_p2) target bundleno = 6 (0x6), region = 81 }
  0xc5   :  { %273 = vsyncpa [#allocation3], 1 }
  0xc6   :  { %275 = vsyncpa [#allocation3 + $0x1], 1 }
  0xc7   :  { %276 = vsyncpa [#allocation6], 1 }
  0xc8   :  { %277 = vsyncpa [#allocation4], 1 }
  0xc9   :  { %279 = vsyncpa [#allocation4 + $0x1], 1 }

</bundles_post_ra>
